<compile_context>
chip_gen: v5e
topology: v5e:2x2
jax: 0.10.0
libtpu: 0.0.40
codegen_flags: <defaults>
</compile_context>

<pallas_src>
import jax
import jax.numpy as jnp
from jax.experimental import pallas as pl
from jax.experimental.pallas import tpu as pltpu


def _round_up(n, m):
    return ((n + m - 1) // m) * m


def _pick_tile_n(hp, vp, budget_bytes=8 << 20):
    # Largest MXU-friendly tile (multiple of 256 preferred, 128 minimum) that
    # divides Vp and keeps 2x double-buffered (Hp, TILE_N) bf16 w_fc tiles
    # within a VMEM budget sized for v7x's 64 MiB physical VMEM.
    for t in (1024, 512, 256, 128):
        if vp % t == 0 and 2 * hp * t * 2 <= budget_bytes:
            return t
    return 128


def _vmem_limit_bytes(b, e, hp, vp, tile_n):
    resident = (b * e * 4 + b * hp * 4            # emb, h_prev
                + e * 3 * hp * 2 + hp * 3 * hp * 2  # w_i, w_h (bf16)
                + 3 * hp * 4 + hp * 4 + vp * 4      # b_i, b_hn, b_fc
                + b * hp * 4)                       # h_new
    tiled = hp * tile_n * 2 + tile_n * 4 + b * tile_n * 4  # w_fc, b_fc, pred tile
    est = 2 * (resident + 2 * tiled) + (4 << 20)            # dbl-buffer + slack
    return int(min(64 << 20, max(32 << 20, est)))


# ----------------------------------------------------------------------------
# Pallas kernel: fused GRU cell (recomputed per fc tile; cheap) + one tile of
# the output projection.  bf16 weights, f32 accumulation and gate math.
# ----------------------------------------------------------------------------
def decoder_gru_kernel(
    emb_ref,     # [B, E]        f32   gathered embeddings (resident)
    h_ref,       # [B, Hp]       f32   previous hidden state, zero-padded
    w_i_ref,     # [E, 3*Hp]     bf16  packed input->gate weights  (r|z|n)
    w_h_ref,     # [Hp, 3*Hp]    bf16  packed hidden->gate weights (r|z|n)
    b_i_ref,     # [1, 3*Hp]     f32   packed biases (b_hr/b_hz folded in)
    b_hn_ref,    # [1, Hp]       f32   hidden bias of the n gate
    w_fc_ref,    # [Hp, TILE_N]  bf16  output projection tile
    b_fc_ref,    # [1, TILE_N]   f32   output bias tile
    pred_ref,    # out: [B, TILE_N] f32
    hnew_ref,    # out: [B, Hp]     f32 (same data written every tile)
):
    f32 = jnp.float32
    bf16 = jnp.bfloat16
    hp = h_ref.shape[-1]

    h = h_ref[...]

    # Two fused MXU matmuls (bf16 operands, f32 accumulation).
    gi = jnp.dot(emb_ref[...].astype(bf16), w_i_ref[...],
                 preferred_element_type=f32) + b_i_ref[...]
    gh = jnp.dot(h.astype(bf16), w_h_ref[...], preferred_element_type=f32)

    # Lane-aligned static slices of the fused (r|z|n) pre-activations.
    gi_r, gi_z, gi_n = gi[:, :hp], gi[:, hp:2 * hp], gi[:, 2 * hp:]
    gh_r, gh_z, gh_n = gh[:, :hp], gh[:, hp:2 * hp], gh[:, 2 * hp:]

    # PyTorch GRU gate math (r, z, n ordering); r/z hidden biases pre-folded.
    r = jax.nn.sigmoid(gi_r + gh_r)
    z = jax.nn.sigmoid(gi_z + gh_z)
    n = jnp.tanh(gi_n + r * (gh_n + b_hn_ref[...]))

    h_new = (1.0 - z) * n + z * h
    # Identical value written on every grid step -> safe under a "parallel"
    # split of the Vp axis across TensorCores.
    hnew_ref[...] = h_new

    # One lane-dense tile of the output projection.
    pred_ref[...] = (jnp.dot(h_new.astype(bf16), w_fc_ref[...],
                             preferred_element_type=f32) + b_fc_ref[...])


# ----------------------------------------------------------------------------
# Padded-state step: carries [B, Hp] hidden state (no per-step pad/slice).
# ----------------------------------------------------------------------------
def decoder_step_padded(emb, h_prev, params):
    """emb: f32 [B, E]; h_prev: f32 [B, Hp]; returns (pred [B, Vp], h_new [B, Hp])."""
    B, E = emb.shape
    Hp = h_prev.shape[-1]
    Vp = params["w_fc"].shape[1]
    tile_n = _pick_tile_n(Hp, Vp)
    grid = (Vp // tile_n,)

    const2d = lambda j: (0, 0)
    in_specs = [
        pl.BlockSpec((B, E), const2d),                  # emb      (resident)
        pl.BlockSpec((B, Hp), const2d),                 # h_prev   (resident)
        pl.BlockSpec((E, 3 * Hp), const2d),             # w_i      (resident)
        pl.BlockSpec((Hp, 3 * Hp), const2d),            # w_h      (resident)
        pl.BlockSpec((1, 3 * Hp), const2d),             # b_i      (resident)
        pl.BlockSpec((1, Hp), const2d),                 # b_hn     (resident)
        pl.BlockSpec((Hp, tile_n), lambda j: (0, j)),   # w_fc tile (streamed)
        pl.BlockSpec((1, tile_n), lambda j: (0, j)),    # b_fc tile
    ]
    out_specs = (
        pl.BlockSpec((B, tile_n), lambda j: (0, j)),    # pred tile
        pl.BlockSpec((B, Hp), const2d),                 # h_new
    )

    inputs = (emb, h_prev,
              params["w_i"], params["w_h"], params["b_i"], params["b_hn"],
              params["w_fc"], params["b_fc"])

    flops = 2 * B * (E * 3 * Hp + Hp * 3 * Hp + Hp * Vp)
    bytes_accessed = sum(a.size * a.dtype.itemsize for a in inputs) \
        + B * Vp * 4 + B * Hp * 4
    cost = pl.CostEstimate(flops=flops,
                           transcendentals=3 * B * Hp,
                           bytes_accessed=int(bytes_accessed))

    pred, h_new = pl.pallas_call(
        decoder_gru_kernel,
        grid=grid,
        in_specs=in_specs,
        out_specs=out_specs,
        out_shape=(
            jax.ShapeDtypeStruct((B, Vp), jnp.float32),
            jax.ShapeDtypeStruct((B, Hp), jnp.float32),
        ),
        compiler_params=pltpu.CompilerParams(
            dimension_semantics=("parallel",),
            vmem_limit_bytes=_vmem_limit_bytes(B, E, Hp, Vp, tile_n),
        ),
        cost_estimate=cost,
    )(*inputs)
    return pred, h_new


# ----------------------------------------------------------------------------
# Module-semantic wrapper: matches Decoder.forward(x, hidden).
# ----------------------------------------------------------------------------
def decoder_forward(x, hidden, params):
    """
    x      : int32 [B]           -- token ids (PyTorch x before .unsqueeze(0))
    hidden : float32 [1, B, H]   -- previous GRU hidden state
    returns (prediction [B, opDim], hidden [1, B, H])
    """
    B = x.shape[0]
    H = hidden.shape[-1]
    op_dim = params["emb"].shape[0]
    Hp = params["w_h"].shape[0]

    # nn.Embedding: a plain row gather.
    emb = jnp.take(params["emb"], x, axis=0)                      # [B, E]
    # Pad/slice only at the module boundary; decode loops should instead call
    # decoder_step_padded directly and carry the padded [B, Hp] state.
    h_prev = jnp.pad(hidden.reshape(B, H), ((0, 0), (0, Hp - H)))

    pred_p, h_new_p = decoder_step_padded(emb, h_prev, params)
    return pred_p[:, :op_dim], h_new_p[:, :H].reshape(1, B, H)


# ----------------------------------------------------------------------------
# Deterministic parameter init.  PyTorch-shaped f32 weights are generated and
# then packed offline into the fused, lane-dense, bf16 layout the kernel eats.
# Weights are stored transposed relative to PyTorch, i.e. as [in, out].
# ----------------------------------------------------------------------------
def init_params(key, op_dim, hidden_dim, embedding_size):
    H, E = hidden_dim, embedding_size
    Hp = _round_up(H, 128)
    Vp = _round_up(op_dim, 128)
    keys = jax.random.split(key, 16)
    bound = 1.0 / jnp.sqrt(jnp.float32(H))

    def u(k, shape):
        return jax.random.uniform(k, shape, jnp.float32, -bound, bound)

    w_ir, w_iz, w_in_ = u(keys[1], (E, H)), u(keys[2], (E, H)), u(keys[3], (E, H))
    w_hr, w_hz, w_hn = u(keys[4], (H, H)), u(keys[5], (H, H)), u(keys[6], (H, H))
    b_ir, b_iz, b_in_ = u(keys[7], (1, H)), u(keys[8], (1, H)), u(keys[9], (1, H))
    b_hr, b_hz, b_hn = u(keys[10], (1, H)), u(keys[11], (1, H)), u(keys[12], (1, H))
    w_fc, b_fc = u(keys[13], (H, op_dim)), u(keys[14], (1, op_dim))

    def pad_cols(w, cols):
        return jnp.pad(w, ((0, 0), (0, cols - w.shape[1])))

    def pack3(r, z, n, rows):
        g = jnp.concatenate(
            [pad_cols(r, Hp), pad_cols(z, Hp), pad_cols(n, Hp)], axis=1)
        return jnp.pad(g, ((0, rows - g.shape[0]), (0, 0)))

    return {
        "emb":  jax.random.normal(keys[0], (op_dim, E), jnp.float32),
        # bf16 MXU weight slabs (f32 accumulation happens in-kernel).
        "w_i":  pack3(w_ir, w_iz, w_in_, E).astype(jnp.bfloat16),    # [E, 3Hp]
        "w_h":  pack3(w_hr, w_hz, w_hn, Hp).astype(jnp.bfloat16),    # [Hp, 3Hp]
        "w_fc": jnp.pad(w_fc, ((0, Hp - H), (0, Vp - op_dim))
                        ).astype(jnp.bfloat16),                      # [Hp, Vp]
        # r/z hidden biases folded into b_i offline; only b_hn kept separate.
        "b_i":  pack3(b_ir + b_hr, b_iz + b_hz, b_in_, 1),           # [1, 3Hp]
        "b_hn": pad_cols(b_hn, Hp),                                  # [1, Hp]
        "b_fc": pad_cols(b_fc, Vp),                                  # [1, Vp]
        # Unpadded f32 copies retained only for the pure-JAX reference checks.
        "_ref": {
            "w_ir": w_ir, "w_iz": w_iz, "w_in": w_in_,
            "w_hr": w_hr, "w_hz": w_hz, "w_hn": w_hn,
            "b_ir": b_ir, "b_iz": b_iz, "b_in": b_in_,
            "b_hr": b_hr, "b_hz": b_hz, "b_hn": b_hn,
            "w_fc": w_fc, "b_fc": b_fc,
        },
    }


# ----------------------------------------------------------------------------
# References.
# ----------------------------------------------------------------------------
def decoder_ref_f32(x, hidden, params):
    """PyTorch-exact GRU + Linear math in f32 (unpadded, unfused weights)."""
    p = params["_ref"]
    B = x.shape[0]
    H = hidden.shape[-1]
    emb = params["emb"][x]
    h = hidden.reshape(B, H)
    r = jax.nn.sigmoid(emb @ p["w_ir"] + p["b_ir"] + h @ p["w_hr"] + p["b_hr"])
    z = jax.nn.sigmoid(emb @ p["w_iz"] + p["b_iz"] + h @ p["w_hz"] + p["b_hz"])
    n = jnp.tanh(emb @ p["w_in"] + p["b_in"] + r * (h @ p["w_hn"] + p["b_hn"]))
    h_new = (1.0 - z) * n + z * h
    pred = h_new @ p["w_fc"] + p["b_fc"]
    return pred, h_new.reshape(1, B, H)


def decoder_ref_bf16(x, hidden, params):
    """Same math as the kernel (bf16 weights / f32 accum) on the packed slabs."""
    f32, bf16 = jnp.float32, jnp.bfloat16
    B = x.shape[0]
    H = hidden.shape[-1]
    op_dim = params["emb"].shape[0]
    Hp = params["w_h"].shape[0]
    emb = jnp.take(params["emb"], x, axis=0)
    h = jnp.pad(hidden.reshape(B, H), ((0, 0), (0, Hp - H)))
    gi = jnp.dot(emb.astype(bf16), params["w_i"],
                 preferred_element_type=f32) + params["b_i"]
    gh = jnp.dot(h.astype(bf16), params["w_h"], preferred_element_type=f32)
    r = jax.nn.sigmoid(gi[:, :Hp] + gh[:, :Hp])
    z = jax.nn.sigmoid(gi[:, Hp:2 * Hp] + gh[:, Hp:2 * Hp])
    n = jnp.tanh(gi[:, 2 * Hp:] + r * (gh[:, 2 * Hp:] + params["b_hn"]))
    h_new = (1.0 - z) * n + z * h
    pred = jnp.dot(h_new.astype(bf16), params["w_fc"],
                   preferred_element_type=f32) + params["b_fc"]
    return pred[:, :op_dim], h_new[:, :H].reshape(1, B, H)


if __name__ == "__main__":
    # Small shapes consistent with the module's forward (one decode step).
    B = 8            # batch
    op_dim = 16      # vocabulary / output dimension (opDim)
    E = 32           # embeddingSize
    H = 32           # hiddenDim

    key = jax.random.PRNGKey(0)
    k_params, k_x, k_h = jax.random.split(key, 3)

    params = init_params(k_params, op_dim, H, E)
    x = jax.random.randint(k_x, (B,), 0, op_dim, dtype=jnp.int32)
    hidden = jax.random.normal(k_h, (1, B, H), jnp.float32)

    fwd = jax.jit(decoder_forward)
    pred, h_new = fwd(x, hidden, params)
    jax.block_until_ready((pred, h_new))

    assert pred.shape == (B, op_dim) and h_new.shape == (1, B, H)

    # Structural check: identical bf16-weight math outside Pallas (tight tol).
    pred_b, h_b = decoder_ref_bf16(x, hidden, params)
    assert jnp.allclose(pred, pred_b, atol=2e-3, rtol=2e-3)
    assert jnp.allclose(h_new, h_b, atol=2e-3, rtol=2e-3)

    # Fidelity check vs. PyTorch-exact f32 math (bf16 weights => looser tol).
    pred_f, h_f = decoder_ref_f32(x, hidden, params)
    assert jnp.allclose(pred, pred_f, atol=3e-2, rtol=3e-2)
    assert jnp.allclose(h_new, h_f, atol=3e-2, rtol=3e-2)

    print("KERNEL_OK")
</pallas_src>

<mosaic_0001>
module attributes {stable_mosaic.version = 11 : i64} {
  func.func @decoder_gru_kernel(%arg0: i32, %arg1: memref<8x32xf32, #tpu.memory_space<vmem>>, %arg2: memref<8x128xf32, #tpu.memory_space<vmem>>, %arg3: memref<32x384xbf16, #tpu.memory_space<vmem>>, %arg4: memref<128x384xbf16, #tpu.memory_space<vmem>>, %arg5: memref<1x384xf32, #tpu.memory_space<vmem>>, %arg6: memref<1x128xf32, #tpu.memory_space<vmem>>, %arg7: memref<128x128xbf16, #tpu.memory_space<vmem>>, %arg8: memref<1x128xf32, #tpu.memory_space<vmem>>, %arg9: memref<8x128xf32, #tpu.memory_space<vmem>>, %arg10: memref<8x128xf32, #tpu.memory_space<vmem>>) attributes {dimension_semantics = [#tpu.dimension_semantics<parallel>], iteration_bounds = array<i64: 1>, scalar_prefetch = 0 : i64, scratch_operands = 0 : i64, tpu.core_type = #tpu.core_type<tc>, window_params = [{pipeline_mode = #tpu.pipeline_mode<synchronous>, transform_indices = @transform_0, window_bounds = array<i64: 8, 32>}, {pipeline_mode = #tpu.pipeline_mode<synchronous>, transform_indices = @transform_1, window_bounds = array<i64: 8, 128>}, {pipeline_mode = #tpu.pipeline_mode<synchronous>, transform_indices = @transform_2, window_bounds = array<i64: 32, 384>}, {pipeline_mode = #tpu.pipeline_mode<synchronous>, transform_indices = @transform_3, window_bounds = array<i64: 128, 384>}, {pipeline_mode = #tpu.pipeline_mode<synchronous>, transform_indices = @transform_4, window_bounds = array<i64: 1, 384>}, {pipeline_mode = #tpu.pipeline_mode<synchronous>, transform_indices = @transform_5, window_bounds = array<i64: 1, 128>}, {transform_indices = @transform_6, window_bounds = array<i64: 128, 128>}, {transform_indices = @transform_7, window_bounds = array<i64: 1, 128>}, {transform_indices = @transform_8, window_bounds = array<i64: 8, 128>}, {pipeline_mode = #tpu.pipeline_mode<synchronous>, transform_indices = @transform_9, window_bounds = array<i64: 8, 128>}]} {
    %c0 = arith.constant 0 : index
    %c0_0 = arith.constant 0 : index
    %0 = vector.load %arg2[%c0, %c0_0] : memref<8x128xf32, #tpu.memory_space<vmem>>, vector<8x128xf32>
    %c0_1 = arith.constant 0 : index
    %c0_2 = arith.constant 0 : index
    %1 = vector.load %arg1[%c0_1, %c0_2] : memref<8x32xf32, #tpu.memory_space<vmem>>, vector<8x32xf32>
    %2 = arith.truncf %1 : vector<8x32xf32> to vector<8x32xbf16>
    %c0_3 = arith.constant 0 : index
    %c0_4 = arith.constant 0 : index
    %3 = vector.load %arg3[%c0_3, %c0_4] : memref<32x384xbf16, #tpu.memory_space<vmem>>, vector<32x384xbf16>
    %cst = arith.constant dense<0.000000e+00> : vector<8x384xf32>
    %4 = tpu.matmul %2, %3, %cst {dimension_numbers = #tpu.dot_dimension_numbers<[1], [0], [0], [1], [0, 0, 1, 1], [], []>} : vector<8x32xbf16>, vector<32x384xbf16>, vector<8x384xf32> -> vector<8x384xf32>
    %c0_5 = arith.constant 0 : index
    %c0_6 = arith.constant 0 : index
    %5 = vector.load %arg5[%c0_5, %c0_6] : memref<1x384xf32, #tpu.memory_space<vmem>>, vector<1x384xf32>
    %6 = vector.broadcast %5 : vector<1x384xf32> to vector<8x384xf32>
    %7 = arith.addf %4, %6 : vector<8x384xf32>
    %8 = arith.truncf %0 : vector<8x128xf32> to vector<8x128xbf16>
    %c0_7 = arith.constant 0 : index
    %c0_8 = arith.constant 0 : index
    %9 = vector.load %arg4[%c0_7, %c0_8] : memref<128x384xbf16, #tpu.memory_space<vmem>>, vector<128x384xbf16>
    %cst_9 = arith.constant dense<0.000000e+00> : vector<8x384xf32>
    %10 = tpu.matmul %8, %9, %cst_9 {dimension_numbers = #tpu.dot_dimension_numbers<[1], [0], [0], [1], [0, 0, 1, 1], [], []>} : vector<8x128xbf16>, vector<128x384xbf16>, vector<8x384xf32> -> vector<8x384xf32>
    %11 = vector.extract_strided_slice %7 {offsets = [0, 0], sizes = [8, 128], strides = [1, 1]} : vector<8x384xf32> to vector<8x128xf32>
    %12 = vector.extract_strided_slice %7 {offsets = [0, 128], sizes = [8, 128], strides = [1, 1]} : vector<8x384xf32> to vector<8x128xf32>
    %13 = vector.extract_strided_slice %7 {offsets = [0, 256], sizes = [8, 128], strides = [1, 1]} : vector<8x384xf32> to vector<8x128xf32>
    %14 = vector.extract_strided_slice %10 {offsets = [0, 0], sizes = [8, 128], strides = [1, 1]} : vector<8x384xf32> to vector<8x128xf32>
    %15 = vector.extract_strided_slice %10 {offsets = [0, 128], sizes = [8, 128], strides = [1, 1]} : vector<8x384xf32> to vector<8x128xf32>
    %16 = vector.extract_strided_slice %10 {offsets = [0, 256], sizes = [8, 128], strides = [1, 1]} : vector<8x384xf32> to vector<8x128xf32>
    %17 = arith.addf %11, %14 : vector<8x128xf32>
    %18 = arith.negf %17 : vector<8x128xf32>
    %19 = math.exp %18 : vector<8x128xf32>
    %cst_10 = arith.constant 1.000000e+00 : f32
    %20 = vector.broadcast %cst_10 : f32 to vector<8x128xf32>
    %21 = arith.addf %20, %19 : vector<8x128xf32>
    %22 = arith.divf %20, %21 : vector<8x128xf32>
    %23 = arith.addf %12, %15 : vector<8x128xf32>
    %24 = arith.negf %23 : vector<8x128xf32>
    %25 = math.exp %24 : vector<8x128xf32>
    %cst_11 = arith.constant 1.000000e+00 : f32
    %26 = vector.broadcast %cst_11 : f32 to vector<8x128xf32>
    %27 = arith.addf %26, %25 : vector<8x128xf32>
    %28 = arith.divf %26, %27 : vector<8x128xf32>
    %c0_12 = arith.constant 0 : index
    %c0_13 = arith.constant 0 : index
    %29 = vector.load %arg6[%c0_12, %c0_13] : memref<1x128xf32, #tpu.memory_space<vmem>>, vector<1x128xf32>
    %30 = vector.broadcast %29 : vector<1x128xf32> to vector<8x128xf32>
    %31 = arith.addf %16, %30 : vector<8x128xf32>
    %32 = arith.mulf %22, %31 : vector<8x128xf32>
    %33 = arith.addf %13, %32 : vector<8x128xf32>
    %34 = math.tanh %33 : vector<8x128xf32>
    %cst_14 = arith.constant 1.000000e+00 : f32
    %35 = vector.broadcast %cst_14 : f32 to vector<8x128xf32>
    %36 = arith.subf %35, %28 : vector<8x128xf32>
    %37 = arith.mulf %36, %34 : vector<8x128xf32>
    %38 = arith.mulf %28, %0 : vector<8x128xf32>
    %39 = arith.addf %37, %38 : vector<8x128xf32>
    %c0_15 = arith.constant 0 : index
    %c0_16 = arith.constant 0 : index
    %40 = vector.load %arg10[%c0_15, %c0_16] : memref<8x128xf32, #tpu.memory_space<vmem>>, vector<8x128xf32>
    tpu.vector_store %arg10[%c0_15, %c0_16], %39 {strides = array<i32>} : memref<8x128xf32, #tpu.memory_space<vmem>>, vector<8x128xf32>,
    %41 = arith.truncf %39 : vector<8x128xf32> to vector<8x128xbf16>
    %c0_17 = arith.constant 0 : index
    %c0_18 = arith.constant 0 : index
    %42 = vector.load %arg7[%c0_17, %c0_18] : memref<128x128xbf16, #tpu.memory_space<vmem>>, vector<128x128xbf16>
    %cst_19 = arith.constant dense<0.000000e+00> : vector<8x128xf32>
    %43 = tpu.matmul %41, %42, %cst_19 {dimension_numbers = #tpu.dot_dimension_numbers<[1], [0], [0], [1], [0, 0, 1, 1], [], []>} : vector<8x128xbf16>, vector<128x128xbf16>, vector<8x128xf32> -> vector<8x128xf32>
    %c0_20 = arith.constant 0 : index
    %c0_21 = arith.constant 0 : index
    %44 = vector.load %arg8[%c0_20, %c0_21] : memref<1x128xf32, #tpu.memory_space<vmem>>, vector<1x128xf32>
    %45 = vector.broadcast %44 : vector<1x128xf32> to vector<8x128xf32>
    %46 = arith.addf %43, %45 : vector<8x128xf32>
    %c0_22 = arith.constant 0 : index
    %c0_23 = arith.constant 0 : index
    %47 = vector.load %arg9[%c0_22, %c0_23] : memref<8x128xf32, #tpu.memory_space<vmem>>, vector<8x128xf32>
    tpu.vector_store %arg9[%c0_22, %c0_23], %46 {strides = array<i32>} : memref<8x128xf32, #tpu.memory_space<vmem>>, vector<8x128xf32>,
    return
  }
  func.func @transform_0(%arg0: i32) -> (i32, i32) {
    %c0_i32 = arith.constant 0 : i32
    %c0_i32_0 = arith.constant 0 : i32
    %c0_i32_1 = arith.constant 0 : i32
    return %c0_i32, %c0_i32_0 : i32, i32
  }
  func.func @transform_1(%arg0: i32) -> (i32, i32) {
    %c0_i32 = arith.constant 0 : i32
    %c0_i32_0 = arith.constant 0 : i32
    %c0_i32_1 = arith.constant 0 : i32
    return %c0_i32, %c0_i32_0 : i32, i32
  }
  func.func @transform_2(%arg0: i32) -> (i32, i32) {
    %c0_i32 = arith.constant 0 : i32
    %c0_i32_0 = arith.constant 0 : i32
    %c0_i32_1 = arith.constant 0 : i32
    return %c0_i32, %c0_i32_0 : i32, i32
  }
  func.func @transform_3(%arg0: i32) -> (i32, i32) {
    %c0_i32 = arith.constant 0 : i32
    %c0_i32_0 = arith.constant 0 : i32
    %c0_i32_1 = arith.constant 0 : i32
    return %c0_i32, %c0_i32_0 : i32, i32
  }
  func.func @transform_4(%arg0: i32) -> (i32, i32) {
    %c0_i32 = arith.constant 0 : i32
    %c0_i32_0 = arith.constant 0 : i32
    %c0_i32_1 = arith.constant 0 : i32
    return %c0_i32, %c0_i32_0 : i32, i32
  }
  func.func @transform_5(%arg0: i32) -> (i32, i32) {
    %c0_i32 = arith.constant 0 : i32
    %c0_i32_0 = arith.constant 0 : i32
    %c0_i32_1 = arith.constant 0 : i32
    return %c0_i32, %c0_i32_0 : i32, i32
  }
  func.func @transform_6(%arg0: i32) -> (i32, i32) {
    %c0_i32 = arith.constant 0 : i32
    %c0_i32_0 = arith.constant 0 : i32
    return %c0_i32, %arg0 : i32, i32
  }
  func.func @transform_7(%arg0: i32) -> (i32, i32) {
    %c0_i32 = arith.constant 0 : i32
    %c0_i32_0 = arith.constant 0 : i32
    return %c0_i32, %arg0 : i32, i32
  }
  func.func @transform_8(%arg0: i32) -> (i32, i32) {
    %c0_i32 = arith.constant 0 : i32
    %c0_i32_0 = arith.constant 0 : i32
    return %c0_i32, %arg0 : i32, i32
  }
  func.func @transform_9(%arg0: i32) -> (i32, i32) {
    %c0_i32 = arith.constant 0 : i32
    %c0_i32_0 = arith.constant 0 : i32
    %c0_i32_1 = arith.constant 0 : i32
    return %c0_i32, %c0_i32_0 : i32, i32
  }
}

</mosaic_0001>

<bundles_post_ra>
// kernel: decoder_forward.1
= control target key start
LH: loop header
LB: loop body
LE: loop exit
PB: predicated region body
PF: predicated region fallthrough
CT: control target
= control target key end

     0   :  { %15 = vsyncpa [#allocation3], 0  ;;  %s914_s0 = inlined_call_operand.vmem [shape: f32[8,32], index: 0, kind: input, shape index: {}]   ;;  %s915_s1 = inlined_call_operand.vmem [shape: f32[8,128], index: 1, kind: input, shape index: {}]   ;;  %s916_s2 = inlined_call_operand.vmem [shape: bf16[32,384], index: 2, kind: input, shape index: {}]   ;;  %s917_s3 = inlined_call_operand.hbm [shape: bf16[128,384], index: 3, kind: input, shape index: {}]   ;;  %s918_s4 = inlined_call_operand.vmem [shape: f32[1,384], index: 4, kind: input, shape index: {}]   ;;  %s919_s5 = inlined_call_operand.vmem [shape: f32[1,128], index: 5, kind: input, shape index: {}]   ;;  %s920_s6 = inlined_call_operand.vmem [shape: bf16[128,128], index: 6, kind: input, shape index: {}]   ;;  %s921_s7 = inlined_call_operand.vmem [shape: f32[1,128], index: 7, kind: input, shape index: {}]   ;;  %s922_s8 = inlined_call_operand.hbm [shape: f32[8,128], index: 8, kind: output, shape index: {0}]   ;;  %s923_s9 = inlined_call_operand.vmem [shape: f32[8,128], index: 9, kind: output, shape index: {1}]  }
   0x1   :  { %16 = vsyncpa [#allocation4], 0  ;;  %s27_s11 = sshll.u32 %s917_s3, 4  ;;  %s763_s12 = smov [#allocation2]   ;;  %s28_s11 = int_to_ptr.hbm [resolvable:$true] %s27_s11 }
   0x2   :  { %s29_s13 = sshll.u32 %s763_s12, 4  ;;  %s764_s14 = smov 192   ;;  %s30_s13 = int_to_ptr.vmem [resolvable:$true] %s29_s13 }
   0x3   :  { %s765_s15 = smov 12  }
   0x4   :  { %35 = dma.hbm_to_vmem [thread:$0]  %s28_s11, 3072, %s30_s13, [#allocation3], %s764_s14, %s764_s14, %s765_s15  }
   0x5   :  { %759 = dma.done.wait [#allocation3], 3072  }
   0x6   :  { %760 = vsyncadd [#allocation3], 4294964224  ;;  %v514_v0 = vld [vmem:[%s916_s2 + $0x18] sm:$0xf]  ;;  %v661_v1 = vld [vmem:[%s916_s2 + $0x20] sm:$0xf0] }
   0x7   :  { %v613_v2 = vld [vmem:[#allocation2 + $0xa8] sm:$0xf]  ;;  %v515_v3 = vor.u32 %v661_v1, %v514_v0  ;;  %v685_v4 = vld [vmem:[#allocation2 + $0xb0] sm:$0xf0]  ;;  %v502_v5 = vld [vmem:[%s916_s2] sm:$0xf] }
   0x8   :  { %v658_v6 = vld [vmem:[%s916_s2 + $0x8] sm:$0xf0]  ;;  %v614_v7 = vor.u32 %v685_v4, %v613_v2  ;;  %v601_v8 = vld [vmem:[#allocation2 + $0x90] sm:$0xf]  ;;  %v682_v9 = vld [vmem:[#allocation2 + $0x98] sm:$0xf0] }
   0x9   :  { %v684_v10 = vld [vmem:[#allocation2 + $0xac] sm:$0xf]  ;;  %110 = vmatpush.bf16.msra.mxu0 %v515_v3  ;;  %v503_v11 = vor.u32 %v658_v6, %v502_v5  ;;  %v615_v12 = vld [vmem:[#allocation2 + $0xb4] sm:$0xf0]  ;;  %v602_v13 = vor.u32 %v682_v9, %v601_v8  ;;  %v679_v16 = vld [vmem:[#allocation2 + $0x80] sm:$0xf0] }
   0xa   :  { %304 = vmatpush.bf16.msra.mxu3 %v614_v7  ;;  %v618_v14 = vor.u32 %v684_v10, %v615_v12  ;;  %v589_v15 = vld [vmem:[#allocation2 + $0x78] sm:$0xf]  ;;  %v681_v17 = vld [vmem:[#allocation2 + $0x94] sm:$0xf]  ;;  %v603_v18 = vld [vmem:[#allocation2 + $0x9c] sm:$0xf0] }
   0xb   :  { %v50_v19 = vld [vmem:[%s914_s0] sm:$0xff]  ;;  %vm100_vm0 = vcmask 261120   ;;  %v590_v20 = vor.u32 %v679_v16, %v589_v15  ;;  %v606_v21 = vor.u32 %v681_v17, %v603_v18  ;;  %v660_v24 = vld [vmem:[%s916_s2 + $0x1c] sm:$0xf]  ;;  %v516_v25 = vld [vmem:[%s916_s2 + $0x24] sm:$0xf0] }
   0xc   :  { %v577_v22 = vld [vmem:[#allocation2 + $0x60] sm:$0xf]  ;;  %v835_v23 = vpack.c.bf16 %v50_v19, %v50_v19  ;;  %v676_v26 = vld [vmem:[#allocation2 + $0x68] sm:$0xf0]  ;;  %v678_v27 = vld [vmem:[#allocation2 + $0x7c] sm:$0xf]  ;;  %v519_v29 = vor.u32 %v660_v24, %v516_v25 }
   0xd   :  { %111 = vmatpush.bf16.msra.mxu0 %v503_v11  ;;  %v591_v28 = vld [vmem:[#allocation2 + $0x84] sm:$0xf0]  ;;  %v657_v30 = vld [vmem:[%s916_s2 + $0x4] sm:$0xf]  ;;  %v504_v31 = vld [vmem:[%s916_s2 + $0xc] sm:$0xf0]  ;;  %v578_v34 = vor.u32 %v676_v26, %v577_v22 }
   0xe   :  { %305 = vmatpush.bf16.msra.mxu3 %v602_v13  ;;  %123 = vmatpush.bf16.msra.mxu1 %v519_v29  ;;  %v507_v32 = vor.u32 %v657_v30, %v504_v31  ;;  %v621_v33 = vld [vmem:[#allocation2 + $0xb0] sm:$0xf]  ;;  %v594_v35 = vor.u32 %v678_v27, %v591_v28  ;;  %v565_v36 = vld [vmem:[#allocation2 + $0x48] sm:$0xf]  ;;  %v686_v37 = vld [vmem:[#allocation2 + $0xb8] sm:$0xf0] }
   0xf   :  { %v673_v38 = vld [vmem:[#allocation2 + $0x50] sm:$0xf0]  ;;  %v675_v39 = vld [vmem:[#allocation2 + $0x64] sm:$0xf]  ;;  %v579_v40 = vld [vmem:[#allocation2 + $0x6c] sm:$0xf0]  ;;  %v622_v41 = vor.u32 %v686_v37, %v621_v33 }
  0x10   :  { %524 = vmatmul.msk.bf16.vlgmr.msra.gmra.mxu0 %vm100_vm0, %v835_v23  ;;  %v609_v42 = vld [vmem:[#allocation2 + $0x98] sm:$0xf]  ;;  %v683_v43 = vld [vmem:[#allocation2 + $0xa0] sm:$0xf0]  ;;  %v566_v44 = vor.u32 %v673_v38, %v565_v36  ;;  %v582_v45 = vor.u32 %v675_v39, %v579_v40  ;;  %v553_v46 = vld [vmem:[#allocation2 + $0x30] sm:$0xf] }
  0x11   :  { %317 = vmatpush.bf16.msrb.mxu0 %v618_v14  ;;  %v670_v47 = vld [vmem:[#allocation2 + $0x38] sm:$0xf0]  ;;  %v672_v48 = vld [vmem:[#allocation2 + $0x4c] sm:$0xf]  ;;  %v567_v49 = vld [vmem:[#allocation2 + $0x54] sm:$0xf0]  ;;  %v610_v50 = vor.u32 %v683_v43, %v609_v42 }
  0x12   :  { %306 = vmatpush.bf16.msra.mxu3 %v590_v20  ;;  %124 = vmatpush.bf16.msra.mxu1 %v507_v32  ;;  %v522_v51 = vld [vmem:[%s916_s2 + $0x20] sm:$0xf]  ;;  %v662_v52 = vld [vmem:[%s916_s2 + $0x28] sm:$0xf0]  ;;  %v510_v56 = vld [vmem:[%s916_s2 + $0x8] sm:$0xf]  ;;  %v554_v58 = vor.u32 %v670_v47, %v553_v46  ;;  %v570_v59 = vor.u32 %v672_v48, %v567_v49 }
  0x13   :  { %v597_v53 = vld [vmem:[#allocation2 + $0x80] sm:$0xf]  ;;  %v680_v54 = vld [vmem:[#allocation2 + $0x88] sm:$0xf0]  ;;  %v523_v55 = vor.u32 %v662_v52, %v522_v51  ;;  %v659_v57 = vld [vmem:[%s916_s2 + $0x10] sm:$0xf0] }
  0x14   :  { %v541_v60 = vld [vmem:[#allocation2 + $0x18] sm:$0xf]  ;;  %v667_v61 = vld [vmem:[#allocation2 + $0x20] sm:$0xf0]  ;;  %v669_v62 = vld [vmem:[#allocation2 + $0x34] sm:$0xf]  ;;  %v598_v0 = vor.u32 %v680_v54, %v597_v53  ;;  %v511_v1 = vor.u32 %v659_v57, %v510_v56 }
  0x15   :  { %318 = vmatpush.bf16.msrb.mxu0 %v606_v21  ;;  %525 = vmatmul.msk.bf16.vlgmr.msra.gmra.mxu1 %vm100_vm0, %v835_v23  ;;  %v555_v63 = vld [vmem:[#allocation2 + $0x3c] sm:$0xf0]  ;;  %v585_v2 = vld [vmem:[#allocation2 + $0x68] sm:$0xf]  ;;  %v677_v3 = vld [vmem:[#allocation2 + $0x70] sm:$0xf0]  ;;  %v542_v4 = vor.u32 %v667_v61, %v541_v60 }
  0x16   :  { %307 = vmatpush.bf16.msra.mxu3 %v578_v34  ;;  %330 = vmatpush.bf16.msrb.mxu1 %v622_v41  ;;  %v558_v5 = vor.u32 %v669_v62, %v555_v63  ;;  %v529_v6 = vld [vmem:[#allocation2] sm:$0xf]  ;;  %v664_v7 = vld [vmem:[#allocation2 + $0x8] sm:$0xf0]  ;;  %v666_v8 = vld [vmem:[#allocation2 + $0x1c] sm:$0xf]  ;;  %v586_v10 = vor.u32 %v677_v3, %v585_v2 }
  0x17   :  { %136 = vmatpush.bf16.msra.mxu2 %v523_v55  ;;  %v543_v9 = vld [vmem:[#allocation2 + $0x24] sm:$0xf0]  ;;  %v573_v11 = vld [vmem:[#allocation2 + $0x50] sm:$0xf]  ;;  %v674_v12 = vld [vmem:[#allocation2 + $0x58] sm:$0xf0]  ;;  %v530_v13 = vor.u32 %v664_v7, %v529_v6 }
  0x18   :  { %v546_v14 = vor.u32 %v666_v8, %v543_v9  ;;  %v868_v15 = vld [vmem:[%s915_s1] sm:$0xff]  ;;  %v531_v17 = vld [vmem:[#allocation2 + $0xc] sm:$0xf0]  ;;  %v574_v18 = vor.u32 %v674_v12, %v573_v11  ;;  %v561_v19 = vld [vmem:[#allocation2 + $0x38] sm:$0xf]  ;;  %s766_s17 = smov [#allocation5]  }
  0x19   :  { %319 = vmatpush.bf16.msrb.mxu0 %v594_v35  ;;  %v663_v16 = vld [vmem:[#allocation2 + $0x4] sm:$0xf]  ;;  %v143_v21 = vpack.c.bf16 %v868_v15, %v868_v15  ;;  %v549_v25 = vld [vmem:[#allocation2 + $0x20] sm:$0xf]  ;;  %v668_v26 = vld [vmem:[#allocation2 + $0x28] sm:$0xf0] }
  0x1a   :  { %308 = vmatpush.bf16.msra.mxu3 %v566_v44  ;;  %331 = vmatpush.bf16.msrb.mxu1 %v610_v50  ;;  %v671_v20 = vld [vmem:[#allocation2 + $0x40] sm:$0xf0]  ;;  %v534_v22 = vor.u32 %v663_v16, %v531_v17  ;;  %v550_v27 = vor.u32 %v668_v26, %v549_v25  ;;  %v537_v28 = vld [vmem:[#allocation2 + $0x8] sm:$0xf]  ;;  %v665_v29 = vld [vmem:[#allocation2 + $0x10] sm:$0xf0] }
  0x1b   :  { %137 = vmatpush.bf16.msra.mxu2 %v511_v1  ;;  %v562_v24 = vor.u32 %v671_v20, %v561_v19  ;;  %v694_v33 = vld [vmem:[%s920_s6 + $0x38] sm:$0xff]  ;;  %v693_v35 = vld [vmem:[%s920_s6 + $0x30] sm:$0xff]  ;;  %v60_v36 = vld [vmem:[%s918_s4] sm:$0x7]  ;;  %s484_s18 = sshll.u32 %s766_s17, 4  ;;  %s486_s1 = sshll.u32 %s922_s8, 4  ;;  %s485_s18 = int_to_ptr.vmem [resolvable:$true] %s484_s18  ;;  %s487_s1 = int_to_ptr.hbm [resolvable:$true] %s486_s1 }
  0x1c   :  { %v63_v37 = vperm.slane %v60_v36, 1  ;;  %v692_v38 = vld [vmem:[%s920_s6 + $0x28] sm:$0xff]  ;;  %v62_v40 = vperm.slane %v60_v36, 0  ;;  %v691_v42 = vld [vmem:[%s920_s6 + $0x20] sm:$0xff]  ;;  %v690_v46 = vld [vmem:[%s920_s6 + $0x18] sm:$0xff]  ;;  %v64_v9 = vperm.slane %v60_v36, 2 }
  0x1d   :  { %320 = vmatpush.bf16.msrb.mxu0 %v582_v45  ;;  %v689_v52 = vld [vmem:[%s920_s6 + $0x10] sm:$0xff]  ;;  %v688_v53 = vld [vmem:[%s920_s6 + $0x8] sm:$0xff] }
  0x1e   :  { %309 = vmatpush.bf16.msra.mxu3 %v554_v58  ;;  %332 = vmatpush.bf16.msrb.mxu1 %v598_v0  ;;  %v687_v58 = vld [vmem:[%s920_s6] sm:$0xff] }
  0x1f   :  { %526 = vmatmul.msk.bf16.vlgmr.msra.gmra.mxu2 %vm100_vm0, %v835_v23  ;;  %v538_v23 = vor.u32 %v665_v29, %v537_v28 }
  0x20   :  { %465 = vmatpush.bf16.msrb.mxu2 %v694_v33 }
  0x21   :  { %321 = vmatpush.bf16.msrb.mxu0 %v570_v59 }
  0x22   :  { %310 = vmatpush.bf16.msra.mxu3 %v542_v4  ;;  %333 = vmatpush.bf16.msrb.mxu1 %v586_v10 }
  0x24   :  { %466 = vmatpush.bf16.msrb.mxu2 %v693_v35 }
  0x25   :  { %322 = vmatpush.bf16.msrb.mxu0 %v558_v5  ;;  %v699_v5 = vld [vmem:[%s919_s5] ss:$0 sm:$0xff] }
  0x26   :  { %311 = vmatpush.bf16.msra.mxu3 %v530_v13  ;;  %334 = vmatpush.bf16.msrb.mxu1 %v574_v18 }
  0x28   :  { %467 = vmatpush.bf16.msrb.mxu2 %v692_v38 }
  0x29   :  { %323 = vmatpush.bf16.msrb.mxu0 %v546_v14  ;;  %312 = vmatmul.bf16.vlgmr.msra.gmra.mxu3 %v143_v21 }
  0x2a   :  { %335 = vmatpush.bf16.msrb.mxu1 %v562_v24 }
  0x2c   :  { %468 = vmatpush.bf16.msrb.mxu2 %v691_v42 }
  0x2d   :  { %324 = vmatpush.bf16.msrb.mxu0 %v534_v22 }
  0x2e   :  { %336 = vmatpush.bf16.msrb.mxu1 %v550_v27 }
  0x30   :  { %325 = vmatmul.bf16.vlgmr.msrb.gmra.mxu0 %v143_v21  ;;  %469 = vmatpush.bf16.msrb.mxu2 %v690_v46 }
  0x32   :  { %337 = vmatpush.bf16.msrb.mxu1 %v538_v23 }
  0x34   :  { %470 = vmatpush.bf16.msrb.mxu2 %v689_v52 }
  0x35   :  { %338 = vmatmul.bf16.vlgmr.msrb.gmra.mxu1 %v143_v21 }
  0x38   :  { %471 = vmatpush.bf16.msrb.mxu2 %v688_v53 }
  0x3c   :  { %472 = vmatpush.bf16.msrb.mxu2 %v687_v58 }
  0x8d   :  { %v113_v30 = vpop.f32.mrf.mxu0 }
  0x8e   :  { %v114_v44 = vadd.f32 %v113_v30, %v62_v40 }
  0x92   :  { %v126_v32 = vpop.f32.mrf.mxu1 }
  0x93   :  { %v127_v41 = vadd.f32 %v126_v32, %v63_v37  ;;  %v700_v32 = vld [vmem:[%s921_s7] ss:$0 sm:$0xff] }
  0x95   :  { %v115_v31 = vpop.f32.mrf.mxu0 }
  0x9a   :  { %v128_v34 = vpop.f32.mrf.mxu1 }
  0xa2   :  { %v139_v39 = vpop.f32.mrf.mxu2 }
  0xa3   :  { %v140_v16 = vadd.f32 %v139_v39, %v64_v9 }
  0xaa   :  { %v141_v50 = vpop.f32.mrf.mxu2 }
  0xac   :  { %v313_v47 = vpop.f32.mrf.mxu3 }
  0xad   :  { %v326_v43 = vpop.f32.mrf.mxu0  ;;  %v343_v49 = vadd.f32 %v313_v47, %v114_v44 }
  0xae   :  { %v363_v45 = vadd.f32 %v326_v43, %v127_v41 }
  0xaf   :  { %v623_v51 = vmul.f32 -1.442695, %v343_v49 }
  0xb0   :  { %v624_v48 = vmul.f32 -1.442695, %v363_v45 }
  0xb2   :  { %701 = vpow2.f32 %v624_v48  ;;  %v339_v55 = vpop.f32.mrf.mxu1 }
  0xb3   :  { %703 = vpow2.f32 %v623_v51  ;;  %v387_v12 = vadd.f32 %v699_v5, %v339_v55 }
  0xb4   :  { %v315_v56 = vpop.f32.mrf.mxu3 }
  0xb5   :  { %v328_v54 = vpop.f32.mrf.mxu0 }
  0xb8   :  { %v702_v57 = vpop.eup %701 }
  0xb9   :  { %v367_v59 = vadd.f32 1.0, %v702_v57  ;;  %v704_v60 = vpop.eup %703 }
  0xba   :  { %v347_v61 = vadd.f32 1.0, %v704_v60  ;;  %v341_v62 = vpop.f32.mrf.mxu1 }
  0xbb   :  { %705 = vrcp.f32 %v367_v59  ;;  %vm373_vm5 = vweird.f32 %v367_v59  ;;  %v379_v20 = vand.u32 2147483648, %v367_v59  ;;  %v377_v21 = vand.u32 2147483647, %v367_v59 }
  0xbc   :  { %707 = vrcp.f32 %v347_v61  ;;  %v359_v6 = vand.u32 2147483648, %v347_v61  ;;  %v357_v8 = vand.u32 2147483647, %v347_v61  ;;  %vm353_vm2 = vweird.f32 %v347_v61 }
  0xbd   :  { %v380_v25 = vor.u32 1.1754944e-38, %v379_v20  ;;  %vm378_vm8 = vcmp.eq.f32.partialorder %v377_v21, 8.507059e+37 }
  0xbe   :  { %v360_v13 = vor.u32 1.1754944e-38, %v359_v6  ;;  %vm358_vm4 = vcmp.eq.f32.partialorder %v357_v8, 8.507059e+37 }
  0xc1   :  { %v706_v63 = vpop.eup %705 }
  0xc2   :  { %v369_v0 = vmul.f32 %v706_v63, %v367_v59  ;;  %v708_v1 = vpop.eup %707  ;;  %vm374_vm6 = vweird.f32 %v706_v63 }
  0xc3   :  { %v349_v2 = vmul.f32 %v708_v1, %v347_v61  ;;  %vm354_vm1 = vweird.f32 %v708_v1  ;;  %vm375_vm7 = vmor %vm373_vm5, %vm374_vm6 }
  0xc4   :  { %v370_v3 = vsub.f32 1.0, %v369_v0  ;;  %vm355_vm3 = vmor %vm353_vm2, %vm354_vm1 }
  0xc5   :  { %v350_v4 = vsub.f32 1.0, %v349_v2 }
  0xc6   :  { %v371_v10 = vmul.f32 %v706_v63, %v370_v3 }
  0xc7   :  { %v351_v7 = vmul.f32 %v708_v1, %v350_v4 }
  0xc8   :  { %v372_v18 = vadd.f32 %v706_v63, %v371_v10 }
  0xc9   :  { %v352_v11 = vadd.f32 %v708_v1, %v351_v7 }
  0xca   :  { %v376_v24 = vsel %vm375_vm7, %v706_v63, %v372_v18 }
  0xcb   :  { %v356_v14 = vsel %vm355_vm3, %v708_v1, %v352_v11  ;;  %v381_v26 = vsel %vm378_vm8, %v380_v25, %v376_v24 }
  0xcc   :  { %v361_v17 = vsel %vm358_vm4, %v360_v13, %v356_v14  ;;  %v391_v27 = vsub.f32 1.0, %v381_v26  ;;  %v393_v23 = vmul.f32 %v381_v26, %v868_v15 }
  0xcd   :  { %v388_v19 = vmul.f32 %v387_v12, %v361_v17 }
  0xcf   :  { %v389_v22 = vadd.f32 %v388_v19, %v140_v16 }
  0xd1   :  { %709 = vtanh.f32 %v389_v22 }
  0xd7   :  { %v710_v28 = vpop.eup %709 }
  0xd8   :  { %v392_v29 = vmul.f32 %v710_v28, %v391_v27 }
  0xda   :  { %v394_v30 = vadd.f32 %v393_v23, %v392_v29 }
  0xdc   :  { %395 = vst [vmem:[%s923_s9] sm:$0xff] %v394_v30  ;;  %v396_v31 = vpack.c.bf16 %v394_v30, %v394_v30 }
  0xde   :  { %473 = vmatmul.bf16.vlgmr.msrb.gmra.mxu2 %v396_v31 }
 0x161   :  { %v474_v33 = vpop.f32.mrf.mxu2 }
 0x162   :  { %v475_v34 = vadd.f32 %v700_v32, %v474_v33 }
 0x164   :  { %478 = vst [vmem:[#allocation5] sm:$0xff] %v475_v34 }
 0x165   :  { %489 = dma.vmem_to_hbm [thread:$0]  %s485_s18, 128, %s487_s1, [#allocation4]  }
 0x169   :  { %v476_v15 = vpop.f32.mrf.mxu2 }
 0x16a   :  { %761 = dma.done.wait [#allocation4], 128  }
 0x16b   :  { %762 = vsyncadd [#allocation4], 4294967168 }
 0x16c   :  { %498 = vsyncpa [#allocation3], 1 }
 0x16d   :  { %499 = vsyncpa [#allocation4], 1 }

</bundles_post_ra>
